<compile_context>
chip_gen: v7x
topology: tpu7x:2x2x1
jax: 0.10.0
libtpu: 0.0.40
codegen_flags: <defaults>
</compile_context>

<pallas_src>
import functools

import jax
import jax.numpy as jnp
from jax.experimental import pallas as pl
from jax.experimental.pallas import tpu as pltpu

LANE = 128


def _round_up(n, m=LANE):
    return ((n + m - 1) // m) * m


# ----------------------------------------------------------------------------
# Fused Pallas kernel: one grid step == one branch (x1 or x2) end-to-end
# ----------------------------------------------------------------------------

def _fused_ft_kernel(x_ref,                       # (1, B, C*H*W)        f32
                     bbw_ref, bbb_ref,            # (C*HW, F) bf16, (1, F) f32
                     p1w_ref, p1gb_ref,           # (F, H) bf16, (2, H) f32
                     p2w_ref, p2gb_ref,           # (H, H) bf16, (2, H) f32
                     p3w_ref, p3gb_ref,           # (H, O) bf16, (2, O) f32
                     h1w_ref, h1gb_ref,           # (O, Ph) bf16, (2, Ph) f32
                     h2w_ref, h2b_ref,            # (Ph, Nc) bf16, (1, Nc) f32
                     o_ref):                      # (1, B, Nc) f32
    x = x_ref[0]                                  # (B, C*HW) f32

    # Backbone stand-in: global-avg-pool folded into the contraction (1/HW
    # pre-scaled into bbw), single MXU matmul with K = C*HW.
    f = jnp.dot(x.astype(jnp.bfloat16), bbw_ref[...],
                preferred_element_type=jnp.float32) + bbb_ref[...]

    def linear_bn(h, w_ref, gb_ref, relu):
        # Linear bias is omitted: a constant per-feature bias cancels exactly
        # under train-mode BatchNorm (mean subtraction).
        y = jnp.dot(h.astype(jnp.bfloat16), w_ref[...],
                    preferred_element_type=jnp.float32)
        mu = jnp.mean(y, axis=0, keepdims=True)
        d = y - mu
        var = jnp.mean(d * d, axis=0, keepdims=True)        # biased variance
        gb = gb_ref[...]
        y = d * jax.lax.rsqrt(var + 1e-5) * gb[0:1, :] + gb[1:2, :]
        if relu:
            y = jnp.maximum(y, 0.0)
        return y

    # projection_MLP: 3 x (Linear + BN), ReLU on the first two layers.
    f = linear_bn(f, p1w_ref, p1gb_ref, relu=True)
    f = linear_bn(f, p2w_ref, p2gb_ref, relu=True)
    f = linear_bn(f, p3w_ref, p3gb_ref, relu=False)

    # prediction_MLP: Linear + BN + ReLU, then plain Linear (+ bias).
    h = linear_bn(f, h1w_ref, h1gb_ref, relu=True)
    out = jnp.dot(h.astype(jnp.bfloat16), h2w_ref[...],
                  preferred_element_type=jnp.float32) + h2b_ref[...]

    o_ref[0] = out


# ----------------------------------------------------------------------------
# Wrapper: single pallas_call for both branches
# ----------------------------------------------------------------------------

def ftmodel_forward(params, x1, x2, *, num_class):
    B, C, H, W = x1.shape
    chw = C * H * W
    xs = jnp.stack([x1.reshape(B, chw), x2.reshape(B, chw)], axis=0)  # (2,B,CHW)

    bbw = params["bb_w"]; bbb = params["bb_b"]
    p1w, p1gb = params["p1_w"], params["p1_gb"]
    p2w, p2gb = params["p2_w"], params["p2_gb"]
    p3w, p3gb = params["p3_w"], params["p3_gb"]
    h1w, h1gb = params["h1_w"], params["h1_gb"]
    h2w, h2b = params["h2_w"], params["h2_b"]

    feat = bbw.shape[1]
    hid = p1w.shape[1]
    proj_out = p3w.shape[1]
    phid_p = h1w.shape[1]
    ncls_p = h2w.shape[1]

    # Rough cost hint so XLA can overlap the surrounding glue with the call.
    flops = 2 * 2 * B * (chw * feat + feat * hid + hid * hid
                         + hid * proj_out + proj_out * phid_p + phid_p * ncls_p)
    transcendentals = 2 * (2 * hid + proj_out + phid_p)        # rsqrt per BN feature
    arrays = (xs, bbw, bbb, p1w, p1gb, p2w, p2gb, p3w, p3gb, h1w, h1gb, h2w, h2b)
    bytes_accessed = sum(int(a.size) * a.dtype.itemsize for a in arrays) \
        + 2 * B * ncls_p * 4

    full = lambda a: pl.BlockSpec(a.shape, lambda i: (0,) * a.ndim)

    out = pl.pallas_call(
        _fused_ft_kernel,
        out_shape=jax.ShapeDtypeStruct((2, B, ncls_p), jnp.float32),
        grid=(2,),
        in_specs=[
            pl.BlockSpec((1, B, chw), lambda i: (i, 0, 0)),
            full(bbw), full(bbb),
            full(p1w), full(p1gb),
            full(p2w), full(p2gb),
            full(p3w), full(p3gb),
            full(h1w), full(h1gb),
            full(h2w), full(h2b),
        ],
        out_specs=pl.BlockSpec((1, B, ncls_p), lambda i: (i, 0, 0)),
        compiler_params=pltpu.CompilerParams(
            dimension_semantics=("parallel",)),
        cost_estimate=pl.CostEstimate(
            flops=flops, transcendentals=transcendentals,
            bytes_accessed=bytes_accessed),
    )(*arrays)

    out = out[:, :, :num_class]                 # drop lane padding
    return out[0], out[1]


# ----------------------------------------------------------------------------
# Parameter construction (deterministic, in-script, kernel-ready layout)
# ----------------------------------------------------------------------------

def make_ftmodel_params(key, *, in_channels, hw, feat_dim, proj_hidden,
                        proj_out, pred_hidden, num_class):
    pred_hidden_p = _round_up(pred_hidden)
    num_class_p = _round_up(num_class)
    keys = jax.random.split(key, 6)

    def lin_w(k, din, dout, scale=0.02):
        return scale * jax.random.normal(k, (din, dout), dtype=jnp.float32)

    def gb(d):
        return jnp.stack([jnp.ones((d,), jnp.float32),
                          jnp.zeros((d,), jnp.float32)], axis=0)   # (2, d)

    params = {}
    # Backbone stand-in: (C, F) weight expanded to (C*HW, F) with 1/HW folded in.
    bb_w_c = lin_w(keys[0], in_channels, feat_dim)
    params["bb_w"] = (jnp.repeat(bb_w_c, hw, axis=0) / hw).astype(jnp.bfloat16)
    params["bb_b"] = jnp.zeros((1, feat_dim), jnp.float32)

    # projection_MLP (biases omitted: they cancel under train-mode BN).
    params["p1_w"] = lin_w(keys[1], feat_dim, proj_hidden).astype(jnp.bfloat16)
    params["p1_gb"] = gb(proj_hidden)
    params["p2_w"] = lin_w(keys[2], proj_hidden, proj_hidden).astype(jnp.bfloat16)
    params["p2_gb"] = gb(proj_hidden)
    params["p3_w"] = lin_w(keys[3], proj_hidden, proj_out).astype(jnp.bfloat16)
    params["p3_gb"] = gb(proj_out)

    # prediction_MLP, lane-padded to 128 (zero pad keeps logical result exact).
    h1 = jnp.zeros((proj_out, pred_hidden_p), jnp.float32)
    h1 = h1.at[:, :pred_hidden].set(lin_w(keys[4], proj_out, pred_hidden))
    params["h1_w"] = h1.astype(jnp.bfloat16)
    params["h1_gb"] = gb(pred_hidden_p)

    h2 = jnp.zeros((pred_hidden_p, num_class_p), jnp.float32)
    h2 = h2.at[:pred_hidden, :num_class].set(lin_w(keys[5], pred_hidden, num_class))
    params["h2_w"] = h2.astype(jnp.bfloat16)
    params["h2_b"] = jnp.zeros((1, num_class_p), jnp.float32)
    return params


# ----------------------------------------------------------------------------
# Main
# ----------------------------------------------------------------------------

if __name__ == "__main__":
    # Small shapes consistent with FTmodel.forward(x1, x2):
    B, C, H, W = 2, 4, 16, 16      # image inputs, NCHW
    FEAT_DIM = 128                  # backbone.output_dim (scaled down from 512/2048)
    PROJ_HIDDEN = PROJ_OUT = 128    # projection_MLP hidden == out (as in the module)
    PRED_HIDDEN = 64                # prediction_MLP hidden_dim (scaled from 512)
    NUM_CLASS = 10                  # args.num_class

    key = jax.random.PRNGKey(0)
    k_params, k_x1, k_x2 = jax.random.split(key, 3)

    params = make_ftmodel_params(
        k_params, in_channels=C, hw=H * W, feat_dim=FEAT_DIM,
        proj_hidden=PROJ_HIDDEN, proj_out=PROJ_OUT,
        pred_hidden=PRED_HIDDEN, num_class=NUM_CLASS)

    x1 = jax.random.normal(k_x1, (B, C, H, W), dtype=jnp.float32)
    x2 = jax.random.normal(k_x2, (B, C, H, W), dtype=jnp.float32)

    fwd = jax.jit(functools.partial(ftmodel_forward, num_class=NUM_CLASS))
    out1, out2 = fwd(params, x1, x2)
    jax.block_until_ready((out1, out2))

    assert out1.shape == (B, NUM_CLASS) and out2.shape == (B, NUM_CLASS)
    assert bool(jnp.all(jnp.isfinite(out1))) and bool(jnp.all(jnp.isfinite(out2)))
    print("KERNEL_OK")
</pallas_src>

<mosaic_0001>
module attributes {stable_mosaic.version = 11 : i64} {
  func.func @_fused_ft_kernel(%arg0: i32, %arg1: memref<1x2x1024xf32, #tpu.memory_space<vmem>>, %arg2: memref<1024x128xbf16, #tpu.memory_space<vmem>>, %arg3: memref<1x128xf32, #tpu.memory_space<vmem>>, %arg4: memref<128x128xbf16, #tpu.memory_space<vmem>>, %arg5: memref<2x128xf32, #tpu.memory_space<vmem>>, %arg6: memref<128x128xbf16, #tpu.memory_space<vmem>>, %arg7: memref<2x128xf32, #tpu.memory_space<vmem>>, %arg8: memref<128x128xbf16, #tpu.memory_space<vmem>>, %arg9: memref<2x128xf32, #tpu.memory_space<vmem>>, %arg10: memref<128x128xbf16, #tpu.memory_space<vmem>>, %arg11: memref<2x128xf32, #tpu.memory_space<vmem>>, %arg12: memref<128x128xbf16, #tpu.memory_space<vmem>>, %arg13: memref<1x128xf32, #tpu.memory_space<vmem>>, %arg14: memref<1x2x128xf32, #tpu.memory_space<vmem>>) attributes {dimension_semantics = [#tpu.dimension_semantics<parallel>], iteration_bounds = array<i64: 2>, scalar_prefetch = 0 : i64, scratch_operands = 0 : i64, tpu.core_type = #tpu.core_type<tc>, window_params = [{transform_indices = @transform_0, window_bounds = array<i64: 1, 2, 1024>}, {pipeline_mode = #tpu.pipeline_mode<synchronous>, transform_indices = @transform_1, window_bounds = array<i64: 1024, 128>}, {pipeline_mode = #tpu.pipeline_mode<synchronous>, transform_indices = @transform_2, window_bounds = array<i64: 1, 128>}, {pipeline_mode = #tpu.pipeline_mode<synchronous>, transform_indices = @transform_3, window_bounds = array<i64: 128, 128>}, {pipeline_mode = #tpu.pipeline_mode<synchronous>, transform_indices = @transform_4, window_bounds = array<i64: 2, 128>}, {pipeline_mode = #tpu.pipeline_mode<synchronous>, transform_indices = @transform_5, window_bounds = array<i64: 128, 128>}, {pipeline_mode = #tpu.pipeline_mode<synchronous>, transform_indices = @transform_6, window_bounds = array<i64: 2, 128>}, {pipeline_mode = #tpu.pipeline_mode<synchronous>, transform_indices = @transform_7, window_bounds = array<i64: 128, 128>}, {pipeline_mode = #tpu.pipeline_mode<synchronous>, transform_indices = @transform_8, window_bounds = array<i64: 2, 128>}, {pipeline_mode = #tpu.pipeline_mode<synchronous>, transform_indices = @transform_9, window_bounds = array<i64: 128, 128>}, {pipeline_mode = #tpu.pipeline_mode<synchronous>, transform_indices = @transform_10, window_bounds = array<i64: 2, 128>}, {pipeline_mode = #tpu.pipeline_mode<synchronous>, transform_indices = @transform_11, window_bounds = array<i64: 128, 128>}, {pipeline_mode = #tpu.pipeline_mode<synchronous>, transform_indices = @transform_12, window_bounds = array<i64: 1, 128>}, {transform_indices = @transform_13, window_bounds = array<i64: 1, 2, 128>}]} {
    %c0 = arith.constant 0 : index
    %c0_0 = arith.constant 0 : index
    %c0_1 = arith.constant 0 : index
    %0 = vector.load %arg1[%c0, %c0_0, %c0_1] : memref<1x2x1024xf32, #tpu.memory_space<vmem>>, vector<1x2x1024xf32>
    %1 = vector.shape_cast %0 : vector<1x2x1024xf32> to vector<2x1024xf32>
    %2 = arith.truncf %1 : vector<2x1024xf32> to vector<2x1024xbf16>
    %c0_2 = arith.constant 0 : index
    %c0_3 = arith.constant 0 : index
    %3 = vector.load %arg2[%c0_2, %c0_3] : memref<1024x128xbf16, #tpu.memory_space<vmem>>, vector<1024x128xbf16>
    %cst = arith.constant dense<0.000000e+00> : vector<2x128xf32>
    %4 = tpu.matmul %2, %3, %cst {dimension_numbers = #tpu.dot_dimension_numbers<[1], [0], [0], [1], [0, 0, 1, 1], [], []>} : vector<2x1024xbf16>, vector<1024x128xbf16>, vector<2x128xf32> -> vector<2x128xf32>
    %c0_4 = arith.constant 0 : index
    %c0_5 = arith.constant 0 : index
    %5 = vector.load %arg3[%c0_4, %c0_5] : memref<1x128xf32, #tpu.memory_space<vmem>>, vector<1x128xf32>
    %6 = vector.broadcast %5 : vector<1x128xf32> to vector<2x128xf32>
    %7 = arith.addf %4, %6 : vector<2x128xf32>
    %8 = arith.truncf %7 : vector<2x128xf32> to vector<2x128xbf16>
    %c0_6 = arith.constant 0 : index
    %c0_7 = arith.constant 0 : index
    %9 = vector.load %arg4[%c0_6, %c0_7] : memref<128x128xbf16, #tpu.memory_space<vmem>>, vector<128x128xbf16>
    %cst_8 = arith.constant dense<0.000000e+00> : vector<2x128xf32>
    %10 = tpu.matmul %8, %9, %cst_8 {dimension_numbers = #tpu.dot_dimension_numbers<[1], [0], [0], [1], [0, 0, 1, 1], [], []>} : vector<2x128xbf16>, vector<128x128xbf16>, vector<2x128xf32> -> vector<2x128xf32>
    %cst_9 = arith.constant dense<0.000000e+00> : vector<128xf32>
    %11 = vector.multi_reduction <add>, %10, %cst_9 [0] : vector<2x128xf32> to vector<128xf32>
    %12 = vector.shape_cast %11 : vector<128xf32> to vector<1x128xf32>
    %cst_10 = arith.constant 2.000000e+00 : f32
    %13 = vector.broadcast %cst_10 : f32 to vector<1x128xf32>
    %14 = arith.divf %12, %13 : vector<1x128xf32>
    %15 = vector.broadcast %14 : vector<1x128xf32> to vector<2x128xf32>
    %16 = arith.subf %10, %15 : vector<2x128xf32>
    %17 = arith.mulf %16, %16 : vector<2x128xf32>
    %cst_11 = arith.constant dense<0.000000e+00> : vector<128xf32>
    %18 = vector.multi_reduction <add>, %17, %cst_11 [0] : vector<2x128xf32> to vector<128xf32>
    %19 = vector.shape_cast %18 : vector<128xf32> to vector<1x128xf32>
    %cst_12 = arith.constant 2.000000e+00 : f32
    %20 = vector.broadcast %cst_12 : f32 to vector<1x128xf32>
    %21 = arith.divf %19, %20 : vector<1x128xf32>
    %c0_13 = arith.constant 0 : index
    %c0_14 = arith.constant 0 : index
    %22 = vector.load %arg5[%c0_13, %c0_14] : memref<2x128xf32, #tpu.memory_space<vmem>>, vector<2x128xf32>
    %cst_15 = arith.constant 9.99999974E-6 : f32
    %23 = vector.broadcast %cst_15 : f32 to vector<1x128xf32>
    %24 = arith.addf %21, %23 : vector<1x128xf32>
    %25 = math.rsqrt %24 : vector<1x128xf32>
    %26 = vector.broadcast %25 : vector<1x128xf32> to vector<2x128xf32>
    %27 = arith.mulf %16, %26 : vector<2x128xf32>
    %28 = vector.extract_strided_slice %22 {offsets = [0, 0], sizes = [1, 128], strides = [1, 1]} : vector<2x128xf32> to vector<1x128xf32>
    %29 = vector.broadcast %28 : vector<1x128xf32> to vector<2x128xf32>
    %30 = arith.mulf %27, %29 : vector<2x128xf32>
    %31 = vector.extract_strided_slice %22 {offsets = [1, 0], sizes = [1, 128], strides = [1, 1]} : vector<2x128xf32> to vector<1x128xf32>
    %32 = vector.broadcast %31 : vector<1x128xf32> to vector<2x128xf32>
    %33 = arith.addf %30, %32 : vector<2x128xf32>
    %cst_16 = arith.constant 0.000000e+00 : f32
    %34 = vector.broadcast %cst_16 : f32 to vector<2x128xf32>
    %35 = arith.maximumf %33, %34 : vector<2x128xf32>
    %36 = arith.truncf %35 : vector<2x128xf32> to vector<2x128xbf16>
    %c0_17 = arith.constant 0 : index
    %c0_18 = arith.constant 0 : index
    %37 = vector.load %arg6[%c0_17, %c0_18] : memref<128x128xbf16, #tpu.memory_space<vmem>>, vector<128x128xbf16>
    %cst_19 = arith.constant dense<0.000000e+00> : vector<2x128xf32>
    %38 = tpu.matmul %36, %37, %cst_19 {dimension_numbers = #tpu.dot_dimension_numbers<[1], [0], [0], [1], [0, 0, 1, 1], [], []>} : vector<2x128xbf16>, vector<128x128xbf16>, vector<2x128xf32> -> vector<2x128xf32>
    %cst_20 = arith.constant dense<0.000000e+00> : vector<128xf32>
    %39 = vector.multi_reduction <add>, %38, %cst_20 [0] : vector<2x128xf32> to vector<128xf32>
    %40 = vector.shape_cast %39 : vector<128xf32> to vector<1x128xf32>
    %cst_21 = arith.constant 2.000000e+00 : f32
    %41 = vector.broadcast %cst_21 : f32 to vector<1x128xf32>
    %42 = arith.divf %40, %41 : vector<1x128xf32>
    %43 = vector.broadcast %42 : vector<1x128xf32> to vector<2x128xf32>
    %44 = arith.subf %38, %43 : vector<2x128xf32>
    %45 = arith.mulf %44, %44 : vector<2x128xf32>
    %cst_22 = arith.constant dense<0.000000e+00> : vector<128xf32>
    %46 = vector.multi_reduction <add>, %45, %cst_22 [0] : vector<2x128xf32> to vector<128xf32>
    %47 = vector.shape_cast %46 : vector<128xf32> to vector<1x128xf32>
    %cst_23 = arith.constant 2.000000e+00 : f32
    %48 = vector.broadcast %cst_23 : f32 to vector<1x128xf32>
    %49 = arith.divf %47, %48 : vector<1x128xf32>
    %c0_24 = arith.constant 0 : index
    %c0_25 = arith.constant 0 : index
    %50 = vector.load %arg7[%c0_24, %c0_25] : memref<2x128xf32, #tpu.memory_space<vmem>>, vector<2x128xf32>
    %cst_26 = arith.constant 9.99999974E-6 : f32
    %51 = vector.broadcast %cst_26 : f32 to vector<1x128xf32>
    %52 = arith.addf %49, %51 : vector<1x128xf32>
    %53 = math.rsqrt %52 : vector<1x128xf32>
    %54 = vector.broadcast %53 : vector<1x128xf32> to vector<2x128xf32>
    %55 = arith.mulf %44, %54 : vector<2x128xf32>
    %56 = vector.extract_strided_slice %50 {offsets = [0, 0], sizes = [1, 128], strides = [1, 1]} : vector<2x128xf32> to vector<1x128xf32>
    %57 = vector.broadcast %56 : vector<1x128xf32> to vector<2x128xf32>
    %58 = arith.mulf %55, %57 : vector<2x128xf32>
    %59 = vector.extract_strided_slice %50 {offsets = [1, 0], sizes = [1, 128], strides = [1, 1]} : vector<2x128xf32> to vector<1x128xf32>
    %60 = vector.broadcast %59 : vector<1x128xf32> to vector<2x128xf32>
    %61 = arith.addf %58, %60 : vector<2x128xf32>
    %cst_27 = arith.constant 0.000000e+00 : f32
    %62 = vector.broadcast %cst_27 : f32 to vector<2x128xf32>
    %63 = arith.maximumf %61, %62 : vector<2x128xf32>
    %64 = arith.truncf %63 : vector<2x128xf32> to vector<2x128xbf16>
    %c0_28 = arith.constant 0 : index
    %c0_29 = arith.constant 0 : index
    %65 = vector.load %arg8[%c0_28, %c0_29] : memref<128x128xbf16, #tpu.memory_space<vmem>>, vector<128x128xbf16>
    %cst_30 = arith.constant dense<0.000000e+00> : vector<2x128xf32>
    %66 = tpu.matmul %64, %65, %cst_30 {dimension_numbers = #tpu.dot_dimension_numbers<[1], [0], [0], [1], [0, 0, 1, 1], [], []>} : vector<2x128xbf16>, vector<128x128xbf16>, vector<2x128xf32> -> vector<2x128xf32>
    %cst_31 = arith.constant dense<0.000000e+00> : vector<128xf32>
    %67 = vector.multi_reduction <add>, %66, %cst_31 [0] : vector<2x128xf32> to vector<128xf32>
    %68 = vector.shape_cast %67 : vector<128xf32> to vector<1x128xf32>
    %cst_32 = arith.constant 2.000000e+00 : f32
    %69 = vector.broadcast %cst_32 : f32 to vector<1x128xf32>
    %70 = arith.divf %68, %69 : vector<1x128xf32>
    %71 = vector.broadcast %70 : vector<1x128xf32> to vector<2x128xf32>
    %72 = arith.subf %66, %71 : vector<2x128xf32>
    %73 = arith.mulf %72, %72 : vector<2x128xf32>
    %cst_33 = arith.constant dense<0.000000e+00> : vector<128xf32>
    %74 = vector.multi_reduction <add>, %73, %cst_33 [0] : vector<2x128xf32> to vector<128xf32>
    %75 = vector.shape_cast %74 : vector<128xf32> to vector<1x128xf32>
    %cst_34 = arith.constant 2.000000e+00 : f32
    %76 = vector.broadcast %cst_34 : f32 to vector<1x128xf32>
    %77 = arith.divf %75, %76 : vector<1x128xf32>
    %c0_35 = arith.constant 0 : index
    %c0_36 = arith.constant 0 : index
    %78 = vector.load %arg9[%c0_35, %c0_36] : memref<2x128xf32, #tpu.memory_space<vmem>>, vector<2x128xf32>
    %cst_37 = arith.constant 9.99999974E-6 : f32
    %79 = vector.broadcast %cst_37 : f32 to vector<1x128xf32>
    %80 = arith.addf %77, %79 : vector<1x128xf32>
    %81 = math.rsqrt %80 : vector<1x128xf32>
    %82 = vector.broadcast %81 : vector<1x128xf32> to vector<2x128xf32>
    %83 = arith.mulf %72, %82 : vector<2x128xf32>
    %84 = vector.extract_strided_slice %78 {offsets = [0, 0], sizes = [1, 128], strides = [1, 1]} : vector<2x128xf32> to vector<1x128xf32>
    %85 = vector.broadcast %84 : vector<1x128xf32> to vector<2x128xf32>
    %86 = arith.mulf %83, %85 : vector<2x128xf32>
    %87 = vector.extract_strided_slice %78 {offsets = [1, 0], sizes = [1, 128], strides = [1, 1]} : vector<2x128xf32> to vector<1x128xf32>
    %88 = vector.broadcast %87 : vector<1x128xf32> to vector<2x128xf32>
    %89 = arith.addf %86, %88 : vector<2x128xf32>
    %90 = arith.truncf %89 : vector<2x128xf32> to vector<2x128xbf16>
    %c0_38 = arith.constant 0 : index
    %c0_39 = arith.constant 0 : index
    %91 = vector.load %arg10[%c0_38, %c0_39] : memref<128x128xbf16, #tpu.memory_space<vmem>>, vector<128x128xbf16>
    %cst_40 = arith.constant dense<0.000000e+00> : vector<2x128xf32>
    %92 = tpu.matmul %90, %91, %cst_40 {dimension_numbers = #tpu.dot_dimension_numbers<[1], [0], [0], [1], [0, 0, 1, 1], [], []>} : vector<2x128xbf16>, vector<128x128xbf16>, vector<2x128xf32> -> vector<2x128xf32>
    %cst_41 = arith.constant dense<0.000000e+00> : vector<128xf32>
    %93 = vector.multi_reduction <add>, %92, %cst_41 [0] : vector<2x128xf32> to vector<128xf32>
    %94 = vector.shape_cast %93 : vector<128xf32> to vector<1x128xf32>
    %cst_42 = arith.constant 2.000000e+00 : f32
    %95 = vector.broadcast %cst_42 : f32 to vector<1x128xf32>
    %96 = arith.divf %94, %95 : vector<1x128xf32>
    %97 = vector.broadcast %96 : vector<1x128xf32> to vector<2x128xf32>
    %98 = arith.subf %92, %97 : vector<2x128xf32>
    %99 = arith.mulf %98, %98 : vector<2x128xf32>
    %cst_43 = arith.constant dense<0.000000e+00> : vector<128xf32>
    %100 = vector.multi_reduction <add>, %99, %cst_43 [0] : vector<2x128xf32> to vector<128xf32>
    %101 = vector.shape_cast %100 : vector<128xf32> to vector<1x128xf32>
    %cst_44 = arith.constant 2.000000e+00 : f32
    %102 = vector.broadcast %cst_44 : f32 to vector<1x128xf32>
    %103 = arith.divf %101, %102 : vector<1x128xf32>
    %c0_45 = arith.constant 0 : index
    %c0_46 = arith.constant 0 : index
    %104 = vector.load %arg11[%c0_45, %c0_46] : memref<2x128xf32, #tpu.memory_space<vmem>>, vector<2x128xf32>
    %cst_47 = arith.constant 9.99999974E-6 : f32
    %105 = vector.broadcast %cst_47 : f32 to vector<1x128xf32>
    %106 = arith.addf %103, %105 : vector<1x128xf32>
    %107 = math.rsqrt %106 : vector<1x128xf32>
    %108 = vector.broadcast %107 : vector<1x128xf32> to vector<2x128xf32>
    %109 = arith.mulf %98, %108 : vector<2x128xf32>
    %110 = vector.extract_strided_slice %104 {offsets = [0, 0], sizes = [1, 128], strides = [1, 1]} : vector<2x128xf32> to vector<1x128xf32>
    %111 = vector.broadcast %110 : vector<1x128xf32> to vector<2x128xf32>
    %112 = arith.mulf %109, %111 : vector<2x128xf32>
    %113 = vector.extract_strided_slice %104 {offsets = [1, 0], sizes = [1, 128], strides = [1, 1]} : vector<2x128xf32> to vector<1x128xf32>
    %114 = vector.broadcast %113 : vector<1x128xf32> to vector<2x128xf32>
    %115 = arith.addf %112, %114 : vector<2x128xf32>
    %cst_48 = arith.constant 0.000000e+00 : f32
    %116 = vector.broadcast %cst_48 : f32 to vector<2x128xf32>
    %117 = arith.maximumf %115, %116 : vector<2x128xf32>
    %118 = arith.truncf %117 : vector<2x128xf32> to vector<2x128xbf16>
    %c0_49 = arith.constant 0 : index
    %c0_50 = arith.constant 0 : index
    %119 = vector.load %arg12[%c0_49, %c0_50] : memref<128x128xbf16, #tpu.memory_space<vmem>>, vector<128x128xbf16>
    %cst_51 = arith.constant dense<0.000000e+00> : vector<2x128xf32>
    %120 = tpu.matmul %118, %119, %cst_51 {dimension_numbers = #tpu.dot_dimension_numbers<[1], [0], [0], [1], [0, 0, 1, 1], [], []>} : vector<2x128xbf16>, vector<128x128xbf16>, vector<2x128xf32> -> vector<2x128xf32>
    %c0_52 = arith.constant 0 : index
    %c0_53 = arith.constant 0 : index
    %121 = vector.load %arg13[%c0_52, %c0_53] : memref<1x128xf32, #tpu.memory_space<vmem>>, vector<1x128xf32>
    %122 = vector.broadcast %121 : vector<1x128xf32> to vector<2x128xf32>
    %123 = arith.addf %120, %122 : vector<2x128xf32>
    %c0_54 = arith.constant 0 : index
    %c0_55 = arith.constant 0 : index
    %c0_56 = arith.constant 0 : index
    %124 = vector.load %arg14[%c0_54, %c0_55, %c0_56] : memref<1x2x128xf32, #tpu.memory_space<vmem>>, vector<1x2x128xf32>
    %125 = vector.shape_cast %124 : vector<1x2x128xf32> to vector<2x128xf32>
    %126 = vector.shape_cast %123 : vector<2x128xf32> to vector<1x2x128xf32>
    tpu.vector_store %arg14[%c0_54, %c0_55, %c0_56], %126 {strides = array<i32>} : memref<1x2x128xf32, #tpu.memory_space<vmem>>, vector<1x2x128xf32>,
    return
  }
  func.func @transform_0(%arg0: i32) -> (i32, i32, i32) {
    %c0_i32 = arith.constant 0 : i32
    %c0_i32_0 = arith.constant 0 : i32
    %c0_i32_1 = arith.constant 0 : i32
    return %arg0, %c0_i32, %c0_i32_0 : i32, i32, i32
  }
  func.func @transform_1(%arg0: i32) -> (i32, i32) {
    %c0_i32 = arith.constant 0 : i32
    %c0_i32_0 = arith.constant 0 : i32
    %c0_i32_1 = arith.constant 0 : i32
    return %c0_i32, %c0_i32_0 : i32, i32
  }
  func.func @transform_2(%arg0: i32) -> (i32, i32) {
    %c0_i32 = arith.constant 0 : i32
    %c0_i32_0 = arith.constant 0 : i32
    %c0_i32_1 = arith.constant 0 : i32
    return %c0_i32, %c0_i32_0 : i32, i32
  }
  func.func @transform_3(%arg0: i32) -> (i32, i32) {
    %c0_i32 = arith.constant 0 : i32
    %c0_i32_0 = arith.constant 0 : i32
    %c0_i32_1 = arith.constant 0 : i32
    return %c0_i32, %c0_i32_0 : i32, i32
  }
  func.func @transform_4(%arg0: i32) -> (i32, i32) {
    %c0_i32 = arith.constant 0 : i32
    %c0_i32_0 = arith.constant 0 : i32
    %c0_i32_1 = arith.constant 0 : i32
    return %c0_i32, %c0_i32_0 : i32, i32
  }
  func.func @transform_5(%arg0: i32) -> (i32, i32) {
    %c0_i32 = arith.constant 0 : i32
    %c0_i32_0 = arith.constant 0 : i32
    %c0_i32_1 = arith.constant 0 : i32
    return %c0_i32, %c0_i32_0 : i32, i32
  }
  func.func @transform_6(%arg0: i32) -> (i32, i32) {
    %c0_i32 = arith.constant 0 : i32
    %c0_i32_0 = arith.constant 0 : i32
    %c0_i32_1 = arith.constant 0 : i32
    return %c0_i32, %c0_i32_0 : i32, i32
  }
  func.func @transform_7(%arg0: i32) -> (i32, i32) {
    %c0_i32 = arith.constant 0 : i32
    %c0_i32_0 = arith.constant 0 : i32
    %c0_i32_1 = arith.constant 0 : i32
    return %c0_i32, %c0_i32_0 : i32, i32
  }
  func.func @transform_8(%arg0: i32) -> (i32, i32) {
    %c0_i32 = arith.constant 0 : i32
    %c0_i32_0 = arith.constant 0 : i32
    %c0_i32_1 = arith.constant 0 : i32
    return %c0_i32, %c0_i32_0 : i32, i32
  }
  func.func @transform_9(%arg0: i32) -> (i32, i32) {
    %c0_i32 = arith.constant 0 : i32
    %c0_i32_0 = arith.constant 0 : i32
    %c0_i32_1 = arith.constant 0 : i32
    return %c0_i32, %c0_i32_0 : i32, i32
  }
  func.func @transform_10(%arg0: i32) -> (i32, i32) {
    %c0_i32 = arith.constant 0 : i32
    %c0_i32_0 = arith.constant 0 : i32
    %c0_i32_1 = arith.constant 0 : i32
    return %c0_i32, %c0_i32_0 : i32, i32
  }
  func.func @transform_11(%arg0: i32) -> (i32, i32) {
    %c0_i32 = arith.constant 0 : i32
    %c0_i32_0 = arith.constant 0 : i32
    %c0_i32_1 = arith.constant 0 : i32
    return %c0_i32, %c0_i32_0 : i32, i32
  }
  func.func @transform_12(%arg0: i32) -> (i32, i32) {
    %c0_i32 = arith.constant 0 : i32
    %c0_i32_0 = arith.constant 0 : i32
    %c0_i32_1 = arith.constant 0 : i32
    return %c0_i32, %c0_i32_0 : i32, i32
  }
  func.func @transform_13(%arg0: i32) -> (i32, i32, i32) {
    %c0_i32 = arith.constant 0 : i32
    %c0_i32_0 = arith.constant 0 : i32
    %c0_i32_1 = arith.constant 0 : i32
    return %arg0, %c0_i32, %c0_i32_0 : i32, i32, i32
  }
}

</mosaic_0001>

<bundles_post_ra>
// kernel: ftmodel_forward.1
= control target key start
LH: loop header
LB: loop body
LE: loop exit
PB: predicated region body
PF: predicated region fallthrough
CT: control target
= control target key end

     0   :  { %18 = vsyncpa [#allocation3], 0  ;;  %s2893_s0 = inlined_call_operand.vmem [shape: f32[2,2,1024], index: 0, kind: input, shape index: {}]   ;;  %s2894_s1 = inlined_call_operand.hbm [shape: bf16[1024,128], index: 1, kind: input, shape index: {}]   ;;  %s2895_s2 = inlined_call_operand.vmem [shape: f32[1,128], index: 2, kind: input, shape index: {}]   ;;  %s2896_s3 = inlined_call_operand.vmem [shape: bf16[128,128], index: 3, kind: input, shape index: {}]   ;;  %s2897_s4 = inlined_call_operand.vmem [shape: f32[2,128], index: 4, kind: input, shape index: {}]   ;;  %s2898_s5 = inlined_call_operand.vmem [shape: bf16[128,128], index: 5, kind: input, shape index: {}]   ;;  %s2899_s6 = inlined_call_operand.vmem [shape: f32[2,128], index: 6, kind: input, shape index: {}]   ;;  %s2900_s7 = inlined_call_operand.vmem [shape: bf16[128,128], index: 7, kind: input, shape index: {}]   ;;  %s2901_s8 = inlined_call_operand.vmem [shape: f32[2,128], index: 8, kind: input, shape index: {}]   ;;  %s2902_s9 = inlined_call_operand.vmem [shape: bf16[128,128], index: 9, kind: input, shape index: {}]   ;;  %s2903_s10 = inlined_call_operand.vmem [shape: f32[2,128], index: 10, kind: input, shape index: {}]   ;;  %s2904_s11 = inlined_call_operand.hbm [shape: bf16[128,128], index: 11, kind: input, shape index: {}]   ;;  %s2905_s12 = inlined_call_operand.vmem [shape: f32[1,128], index: 12, kind: input, shape index: {}]   ;;  %s2906_s13 = inlined_call_operand.vmem [shape: f32[2,2,128], index: 13, kind: output, shape index: {}]  }
   0x1   :  { %19 = vsyncpa [#allocation5], 0  ;;  %s2595_s25 = smov 0  }
   0x2 LB: > { %s2601_s26 = sadd.s32 4294967295, %s2516_s25   ;;  %p1946_p0 = scmp.ge.s32.totalorder %s2516_s25, 1  ;;  %s2516_s25 = sphi %s2595_s25, %s25_s25  }
   0x3   : > { %p334_p1 = scmp.lt.s32.totalorder %s2516_s25, 3  ;;  %s2518_s27 = smov [#allocation2]  }
   0x4   : > { %s346_s28 = sshll.u32 %s2518_s27, 4  ;;  %p2907_p3 = scmp.eq.s32.totalorder %s2601_s26, 0  ;;  %s347_s28 = int_to_ptr.vmem [resolvable:$true] %s346_s28 }
   0x5   : > { %p2605_p2 = pnand %p1946_p0, %p334_p1  ;;  %s2519_s30 = smov [#allocation4]  }
   0x6   : > { %s386_s14 = sshll.u32 %s2519_s30, 4  ;;  %s2446_s18 = scalar_lea.hbm %s2894_s1, 8192  ;;  %s2618_s14 = int_to_ptr.vmem [resolvable:$true] %s386_s14 }
   0x7   : > { %s2909_s29 = scalar_select %p2605_p2, 1, 0 }
   0x8   : > { %p2306_p4 = pneg %p2605_p2  ;;  %p2447_p6 = scmp.ne.s32.totalorder %s2894_s1, %s2446_s18 }
   0x9   : > { %p2453_p10 = scmp.lt.u32.totalorder %s2446_s18, %s2894_s1 }
   0xa   : > { %p2614_p5 = pnand %p2907_p3, %p2306_p4 }
   0xc   : > { %p2448_p7 = pneg %p2614_p5 }
   0xe   : > { %p2449_p8 = pnand %p2448_p7, %p2447_p6 }
  0x10   : > { %p2450_p9 = pneg %p2449_p8 }
  0x12   : > { %p2455_p11 = pnand %p2453_p10, %p2450_p9 }
  0x14   : > { %2458 = shalt.err (!%p2455_p11)
}
  0x15   : > { %s2459_s23 = scalar_lea.vmem %s347_s28, 8192  ;;  %p2467_p1 = scmp.lt.s32.totalorder %s347_s28, %s347_s28 }
  0x16   : > { %p2460_p12 = scmp.ne.s32.totalorder %s347_s28, %s2459_s23  ;;  %p2468_p4 = scmp.lt.s32.totalorder %s2459_s23, %s2459_s23 }
  0x18   : > { %p2462_p13 = pnand %p2460_p12, %p2448_p7  ;;  %p2469_p3 = por %p2468_p4, %p2467_p1 }
  0x1a   : > { %p2463_p0 = pneg %p2462_p13 }
  0x1c   : > { %p2470_p2 = pnand %p2469_p3, %p2463_p0 }
  0x1e   : > { %2473 = shalt.err (!%p2470_p2)
}
  0x1f   : > { %s2520_s24 = smov 64   ;;  %s2521_s27 = smov 4  }
  0x20   : > { %2309 = dma.hbm_to_vmem [thread:$0]  (!%p2614_p5), %s2894_s1, 8192, %s347_s28, [#allocation3], %s2520_s24, %s2520_s24, %s2521_s27  }
  0x21   : > { %s2474_s19 = scalar_lea.hbm %s2904_s11, 1024 }
  0x22   : > { %p2475_p6 = scmp.ne.s32.totalorder %s2904_s11, %s2474_s19  ;;  %p2481_p8 = scmp.lt.u32.totalorder %s2474_s19, %s2904_s11 }
  0x24   : > { %p2477_p2 = pnand %p2475_p6, %p2448_p7 }
  0x26   : > { %p2478_p3 = pneg %p2477_p2 }
  0x28   : > { %p2483_p9 = pnand %p2481_p8, %p2478_p3 }
  0x2a   : > { %2486 = shalt.err (!%p2483_p9)
}
  0x2b   : > { %s2487_s28 = scalar_lea.vmem %s2618_s14, 1024  ;;  %p2495_p13 = scmp.lt.s32.totalorder %s2618_s14, %s2618_s14 }
  0x2c   : > { %p2488_p10 = scmp.ne.s32.totalorder %s2618_s14, %s2487_s28  ;;  %p2496_p0 = scmp.lt.s32.totalorder %s2487_s28, %s2487_s28 }
  0x2e   : > { %p2490_p11 = pnand %p2488_p10, %p2448_p7  ;;  %p2497_p1 = por %p2496_p0, %p2495_p13 }
  0x30   : > { %p2491_p12 = pneg %p2490_p11 }
  0x32   : > { %p2498_p4 = pnand %p2497_p1, %p2491_p12 }
  0x34   : > { %2501 = shalt.err (!%p2498_p4)
}
  0x35   : > { %2312 = dma.hbm_to_vmem [thread:$0]  (!%p2614_p5), %s2904_s11, 1024, %s2618_s14, [#allocation5], %s2520_s24, %s2520_s24, %s2521_s27  }
  0x36   : > { %p2911_p6 = scmp.ne.s32.totalorder %s2909_s29, 0 }
  0x37   : > { %p2912_p2 = scmp.eq.s32.totalorder (!%p2911_p6), %s2601_s26, 0 }
  0x38   : > { %413 = sbr.rel (%p2911_p6) target bundleno = 1643 (0x66b), region = 72 }
  0x3f   : > { %2507 = dma.done.wait (%p2912_p2), [#allocation3], 8192   ;;  %p2913_p7 = pmov %p2912_p2 }
  0x40   : > { %p2914_p3 = pmov %p2912_p2 }
  0x41   : > { %2509 = vsyncadd (%p2913_p7), [#allocation3], 4294959104 }
  0x42   : > { %2511 = dma.done.wait (%p2914_p3), [#allocation5], 1024   ;;  %p2915_p8 = pmov %p2912_p2 }
  0x43   : > { %v2332_v0 = vld [vmem:[#allocation2 + $0x40] sm:$0xff]   ;;  %v2336_v4 = vld [vmem:[#allocation2 + $0x48] sm:$0xff]   ;;  %v2340_v8 = vld [vmem:[#allocation2 + $0x50] sm:$0xff]   ;;  %p460_p5 = scmp.lt.s32.totalorder %s2601_s26, 1  ;;  %v2522_v22 = vmov 1983009808   ;;  %v478_v24 = vlaneseq }
  0x44   : > { %2513 = vsyncadd (%p2915_p8), [#allocation5], 4294966272  ;;  %v2333_v1 = vld [vmem:[#allocation2 + $0xc0] sm:$0xff]   ;;  %2065 = vmatprep.subr.bf16.mxu0 %v2332_v0  ;;  %v2337_v5 = vld [vmem:[#allocation2 + $0xc8] sm:$0xff]   ;;  %v476_v23 = vunpack.c.l.s4 %v2522_v22  ;;  %vm2524_vm0 = vmmov 0   ;;  %vm1308_vm1 = vcmask 1041408  }
  0x45   : > { %v2334_v2 = vld [vmem:[#allocation2] sm:$0xff]   ;;  %2087 = vmatprep.subr.bf16.mxu1 %v2333_v1  ;;  %v2338_v6 = vld [vmem:[#allocation2 + $0x8] sm:$0xff]   ;;  %v2341_v9 = vld [vmem:[#allocation2 + $0xd0] sm:$0xff]   ;;  %s2917_s26 = smov (!%p460_p5, %s2601_s26), 1  ;;  %v2681_v30 = vshrl.u32 %v478_v24, 7 }
  0x46   : > { %v2335_v3 = vld [vmem:[#allocation2 + $0x80] sm:$0xff]   ;;  %2066 = vmatpush3.bf16.msra.mxu0 %v2334_v2  ;;  %v2339_v7 = vld [vmem:[#allocation2 + $0x88] sm:$0xff]   ;;  %v2342_v10 = vld [vmem:[#allocation2 + $0x10] sm:$0xff]   ;;  %v477_v29 = vunpack.c.0.s8 %v476_v23  ;;  %s2064_s29 = sshll.u32 %s2917_s26, 4 }
  0x47   : > { %2088 = vmatpush3.bf16.msra.mxu1 %v2335_v3  ;;  %2067 = vmatprep.subr.bf16.mxu0 %v2336_v4  ;;  %v2343_v11 = vld [vmem:[#allocation2 + $0x90] sm:$0xff]   ;;  %v2344_v12 = vld [vmem:[#allocation2 + $0x58] sm:$0xff]   ;;  %v2348_v16 = vld [vmem:[#allocation2 + $0x60] sm:$0xff]   ;;  %s464_s24 = scalar_lea.vmem %s2893_s0, %s2064_s29 }
  0x48   : > { %2089 = vmatprep.subr.bf16.mxu1 %v2337_v5  ;;  %v2345_v13 = vld [vmem:[#allocation2 + $0xd8] sm:$0xff]   ;;  %v2349_v17 = vld [vmem:[#allocation2 + $0xe0] sm:$0xff]   ;;  %v2352_v20 = vld [vmem:[#allocation2 + $0x68] sm:$0xff]   ;;  %v480_v35 = vsub.s32 %v477_v29, %v2681_v30 }
  0x49   : > { %v2346_v14 = vld [vmem:[#allocation2 + $0x18] sm:$0xff]   ;;  %v2350_v18 = vld [vmem:[#allocation2 + $0x20] sm:$0xff]   ;;  %v2353_v21 = vld [vmem:[#allocation2 + $0xe8] sm:$0xff]  }
  0x4a   : > { %2068 = vmatpush3.bf16.msra.mxu0 %v2338_v6  ;;  %v2347_v15 = vld [vmem:[#allocation2 + $0x98] sm:$0xff]   ;;  %v2351_v19 = vld [vmem:[#allocation2 + $0xa0] sm:$0xff]   ;;  %v2354_v25 = vld [vmem:[#allocation2 + $0x28] sm:$0xff]  }
  0x4b   : > { %2090 = vmatpush3.bf16.msra.mxu1 %v2339_v7  ;;  %2069 = vmatprep.subr.bf16.mxu0 %v2340_v8  ;;  %v2355_v26 = vld [vmem:[#allocation2 + $0xa8] sm:$0xff]   ;;  %v2356_v27 = vld [vmem:[#allocation2 + $0x70] sm:$0xff]   ;;  %v2360_v33 = vld [vmem:[#allocation2 + $0x78] sm:$0xff]  }
  0x4c   : > { %2091 = vmatprep.subr.bf16.mxu1 %v2341_v9  ;;  %v2357_v28 = vld [vmem:[#allocation2 + $0xf0] sm:$0xff]   ;;  %v2361_v34 = vld [vmem:[#allocation2 + $0xf8] sm:$0xff]   ;;  %v470_v38 = vld [vmem:[%s464_s24] sm:$0xff] }
  0x4d   : > { %v2358_v31 = vld [vmem:[#allocation2 + $0x30] sm:$0xff]   ;;  %v2362_v36 = vld [vmem:[#allocation2 + $0x38] sm:$0xff]   ;;  %v471_v39 = vld [vmem:[%s464_s24 + $0x8] sm:$0xff]  ;;  %v481_v40 = vrot.slane %v470_v38, %v480_v35  ;;  %v474_v42 = vcombine.high %v470_v38, %v470_v38  ;;  %s1955_s24 = sshll.u32 %s2917_s26, 1 }
  0x4e   : > { %2070 = vmatpush3.bf16.msra.mxu0 %v2342_v10  ;;  %v2359_v32 = vld [vmem:[#allocation2 + $0xb0] sm:$0xff]   ;;  %v2363_v37 = vld [vmem:[#allocation2 + $0xb8] sm:$0xff]   ;;  %v491_v41 = vcombine.high %v471_v39, %v471_v39  ;;  %v2366_v43 = vld [vmem:[#allocation2 + $0x140] sm:$0xff]   ;;  %v2688_v44 = vrot.slane %v471_v39, %v480_v35  ;;  %s468_s20 = scalar_lea.vmem %s2906_s13, %s1955_s24 }
  0x4f   : > { %2092 = vmatpush3.bf16.msra.mxu1 %v2343_v11  ;;  %2071 = vmatprep.subr.bf16.mxu0 %v2344_v12  ;;  %v2367_v45 = vld [vmem:[#allocation2 + $0x1c0] sm:$0xff]   ;;  %v489_v46 = vcombine.high %v481_v40, %v481_v40  ;;  %v488_v47 = vrot.slane %v474_v42, %v480_v35  ;;  %v516_v49 = vpack.c.bf16 %v481_v40, %v481_v40  ;;  %v2370_v56 = vld [vmem:[#allocation2 + $0x148] sm:$0xff]   ;;  %v2374_v0 = vld [vmem:[#allocation2 + $0x150] sm:$0xff]  }
  0x50   : > { %2093 = vmatprep.subr.bf16.mxu1 %v2345_v13  ;;  %v506_v48 = vcombine.high %v2688_v44, %v2688_v44  ;;  %v2368_v50 = vld [vmem:[#allocation2 + $0x100] sm:$0xff]   ;;  %v2692_v51 = vrot.slane %v491_v41, %v480_v35  ;;  %v2371_v59 = vld [vmem:[#allocation2 + $0x1c8] sm:$0xff]   ;;  %v2375_v1 = vld [vmem:[#allocation2 + $0x1d0] sm:$0xff]   ;;  %v520_v24 = vpack.c.bf16 %v2688_v44, %v2688_v44 }
  0x51   : > { %v517_v52 = vpack.c.bf16 %v489_v46, %v489_v46  ;;  %v490_v53 = vcombine.high %v488_v47, %v488_v47  ;;  %v2369_v54 = vld [vmem:[#allocation2 + $0x180] sm:$0xff]   ;;  %v518_v55 = vpack.c.bf16 %v488_v47, %v488_v47  ;;  %v2372_v61 = vld [vmem:[#allocation2 + $0x108] sm:$0xff]   ;;  %v2376_v2 = vld [vmem:[#allocation2 + $0x110] sm:$0xff]  }
  0x52   : > { %2072 = vmatpush3.bf16.msra.mxu0 %v2346_v14  ;;  %v507_v57 = vcombine.high %v2692_v51, %v2692_v51  ;;  %v521_v60 = vpack.c.bf16 %v506_v48, %v506_v48  ;;  %v2373_v63 = vld [vmem:[#allocation2 + $0x188] sm:$0xff]   ;;  %v2377_v3 = vld [vmem:[#allocation2 + $0x190] sm:$0xff]   ;;  %v2378_v4 = vld [vmem:[#allocation2 + $0x158] sm:$0xff]  }
  0x53   : > { %2094 = vmatpush3.bf16.msra.mxu1 %v2347_v15  ;;  %2073 = vmatprep.subr.bf16.mxu0 %v2348_v16  ;;  %v519_v58 = vpack.c.bf16 %v490_v53, %v490_v53  ;;  %v2379_v5 = vld [vmem:[#allocation2 + $0x1d8] sm:$0xff]   ;;  %v2382_v8 = vld [vmem:[#allocation2 + $0x160] sm:$0xff]   ;;  %v2386_v12 = vld [vmem:[#allocation2 + $0x168] sm:$0xff]  }
  0x54   : > { %2095 = vmatprep.subr.bf16.mxu1 %v2349_v17  ;;  %1075 = vmatprep.mubr.bf16.mxu0 %v517_v52  ;;  %v523_v62 = vpack.c.bf16 %v507_v57, %v507_v57  ;;  %v2380_v6 = vld [vmem:[#allocation2 + $0x118] sm:$0xff]   ;;  %v2383_v9 = vld [vmem:[#allocation2 + $0x1e0] sm:$0xff]   ;;  %v2387_v13 = vld [vmem:[#allocation2 + $0x1e8] sm:$0xff]  }
  0x55   : > { %1115 = vmatprep.mubr.bf16.mxu1 %v519_v58  ;;  %v2381_v7 = vld [vmem:[#allocation2 + $0x198] sm:$0xff]   ;;  %v2384_v10 = vld [vmem:[#allocation2 + $0x120] sm:$0xff]   ;;  %v2388_v14 = vld [vmem:[#allocation2 + $0x128] sm:$0xff]  }
  0x56   : > { %2074 = vmatpush3.bf16.msra.mxu0 %v2350_v18  ;;  %v2385_v11 = vld [vmem:[#allocation2 + $0x1a0] sm:$0xff]   ;;  %v2389_v15 = vld [vmem:[#allocation2 + $0x1a8] sm:$0xff]   ;;  %v2390_v16 = vld [vmem:[#allocation2 + $0x170] sm:$0xff]  }
  0x57   : > { %2096 = vmatpush3.bf16.msra.mxu1 %v2351_v19  ;;  %2075 = vmatprep.subr.bf16.mxu0 %v2352_v20  ;;  %v2391_v17 = vld [vmem:[#allocation2 + $0x1f0] sm:$0xff]   ;;  %v2394_v20 = vld [vmem:[#allocation2 + $0x178] sm:$0xff]  }
  0x58   : > { %2097 = vmatprep.subr.bf16.mxu1 %v2353_v21  ;;  %v2392_v18 = vld [vmem:[#allocation2 + $0x130] sm:$0xff]   ;;  %v2395_v21 = vld [vmem:[#allocation2 + $0x1f8] sm:$0xff]  }
  0x59   : > { %v2393_v19 = vld [vmem:[#allocation2 + $0x1b0] sm:$0xff]   ;;  %v2396_v22 = vld [vmem:[#allocation2 + $0x138] sm:$0xff]  }
  0x5a   : > { %2076 = vmatpush3.bf16.msra.mxu0 %v2354_v25  ;;  %v2397_v23 = vld [vmem:[#allocation2 + $0x1b8] sm:$0xff]   ;;  %v522_v25 = vpack.c.bf16 %v2692_v51, %v2692_v51  ;;  %v2400_v29 = vld [vmem:[%s2896_s3 + $0x10] sm:$0xff]  }
  0x5b   : > { %2098 = vmatpush3.bf16.msra.mxu1 %v2355_v26  ;;  %2077 = vmatprep.subr.bf16.mxu0 %v2356_v27  ;;  %v2398_v26 = vld [vmem:[%s2896_s3] sm:$0xff]   ;;  %v2523_v27 = vmov 0.0   ;;  %v2405_v35 = vld [vmem:[%s2896_s3 + $0x38] sm:$0xff]  }
  0x5c   : > { %2099 = vmatprep.subr.bf16.mxu1 %v2357_v28  ;;  %v2399_v28 = vld [vmem:[%s2896_s3 + $0x8] sm:$0xff]  }
  0x5e   : > { %2078 = vmatpush3.bf16.msra.mxu0 %v2358_v31  ;;  %v2401_v31 = vld [vmem:[%s2896_s3 + $0x18] sm:$0xff]  }
  0x5f   : > { %2100 = vmatpush3.bf16.msra.mxu1 %v2359_v32  ;;  %2079 = vmatprep.subr.bf16.mxu0 %v2360_v33  ;;  %v2402_v32 = vld [vmem:[%s2896_s3 + $0x20] sm:$0xff]   ;;  %v2403_v33 = vld [vmem:[%s2896_s3 + $0x28] sm:$0xff]  }
  0x60   : > { %2101 = vmatprep.subr.bf16.mxu1 %v2361_v34  ;;  %v2404_v34 = vld [vmem:[%s2896_s3 + $0x30] sm:$0xff]  }
  0x62   : > { %2080 = vmatpush3.bf16.msra.mxu0 %v2362_v36 }
  0x63   : > { %2102 = vmatpush3.bf16.msra.mxu1 %v2363_v37  ;;  %2109 = vmatprep.subr.bf16.mxu0 %v2366_v43  ;;  %v1956_v37 = vld [vmem:[%s2895_s2] ss:$0 sm:$0xff] }
  0x64   : > { %2131 = vmatprep.subr.bf16.mxu1 %v2367_v45 }
  0x65   : > { %1076 = vmatmul.mubr.bf16.vlgmr.msra.gmra.mrb[0].mxu0 %v516_v49 }
  0x66   : > { %2110 = vmatpush3.bf16.msra.mxu0 %v2368_v50  ;;  %1116 = vmatmul.mubr.bf16.vlgmr.msra.gmra.mrb[0].mxu1 %v518_v55 }
  0x67   : > { %2111 = vmatprep.subr.bf16.mxu0 %v2370_v56  ;;  %2132 = vmatpush3.bf16.msra.mxu1 %v2369_v54 }
  0x68   : > { %1155 = vmatprep.mubr.bf16.mxu0 %v521_v60  ;;  %2133 = vmatprep.subr.bf16.mxu1 %v2371_v59 }
  0x69   : > { %1195 = vmatprep.mubr.bf16.mxu1 %v523_v62  ;;  %v2406_v62 = vld [vmem:[%s2898_s5] sm:$0xff]  }
  0x6a   : > { %2112 = vmatpush3.bf16.msra.mxu0 %v2372_v61 }
  0x6b   : > { %2113 = vmatprep.subr.bf16.mxu0 %v2374_v0  ;;  %2134 = vmatpush3.bf16.msra.mxu1 %v2373_v63  ;;  %v2407_v63 = vld [vmem:[%s2898_s5 + $0x8] sm:$0xff]   ;;  %v2408_v0 = vld [vmem:[%s2898_s5 + $0x10] sm:$0xff]  }
  0x6c   : > { %2135 = vmatprep.subr.bf16.mxu1 %v2375_v1  ;;  %v2409_v1 = vld [vmem:[%s2898_s5 + $0x18] sm:$0xff]  }
  0x6e   : > { %2114 = vmatpush3.bf16.msra.mxu0 %v2376_v2  ;;  %v2410_v2 = vld [vmem:[%s2898_s5 + $0x20] sm:$0xff]  }
  0x6f   : > { %2115 = vmatprep.subr.bf16.mxu0 %v2378_v4  ;;  %2136 = vmatpush3.bf16.msra.mxu1 %v2377_v3  ;;  %v2411_v3 = vld [vmem:[%s2898_s5 + $0x28] sm:$0xff]   ;;  %v2412_v4 = vld [vmem:[%s2898_s5 + $0x30] sm:$0xff]  }
  0x70   : > { %2137 = vmatprep.subr.bf16.mxu1 %v2379_v5  ;;  %v2413_v5 = vld [vmem:[%s2898_s5 + $0x38] sm:$0xff]  }
  0x72   : > { %2116 = vmatpush3.bf16.msra.mxu0 %v2380_v6 }
  0x73   : > { %2117 = vmatprep.subr.bf16.mxu0 %v2382_v8  ;;  %2138 = vmatpush3.bf16.msra.mxu1 %v2381_v7 }
  0x74   : > { %2139 = vmatprep.subr.bf16.mxu1 %v2383_v9 }
  0x76   : > { %2118 = vmatpush3.bf16.msra.mxu0 %v2384_v10 }
  0x77   : > { %2119 = vmatprep.subr.bf16.mxu0 %v2386_v12  ;;  %2140 = vmatpush3.bf16.msra.mxu1 %v2385_v11 }
  0x78   : > { %2141 = vmatprep.subr.bf16.mxu1 %v2387_v13 }
  0x7a   : > { %2120 = vmatpush3.bf16.msra.mxu0 %v2388_v14 }
  0x7b   : > { %2121 = vmatprep.subr.bf16.mxu0 %v2390_v16  ;;  %2142 = vmatpush3.bf16.msra.mxu1 %v2389_v15 }
  0x7c   : > { %2143 = vmatprep.subr.bf16.mxu1 %v2391_v17 }
  0x7e   : > { %2122 = vmatpush3.bf16.msra.mxu0 %v2392_v18 }
  0x7f   : > { %2123 = vmatprep.subr.bf16.mxu0 %v2394_v20  ;;  %2144 = vmatpush3.bf16.msra.mxu1 %v2393_v19 }
  0x80   : > { %2145 = vmatprep.subr.bf16.mxu1 %v2395_v21 }
  0x82   : > { %2124 = vmatpush3.bf16.msra.mxu0 %v2396_v22 }
  0x83   : > { %2146 = vmatpush3.bf16.msra.mxu1 %v2397_v23  ;;  %2198 = vmatprep.subr.bf16.mxu0 %v2523_v27 }
  0x84   : > { %2218 = vmatprep.subr.bf16.mxu1 %v2523_v27 }
  0x85   : > { %1156 = vmatmul.mubr.bf16.vlgmr.msra.gmra.mrb[4].mxu0 %v520_v24 }
  0x86   : > { %1196 = vmatmul.mubr.bf16.vlgmr.msra.gmra.mrb[4].mxu1 %v522_v25  ;;  %2199 = vmatpush3.bf16.msra.mxu0 %v2398_v26 }
  0x87   : > { %2200 = vmatprep.subr.bf16.mxu0 %v2523_v27  ;;  %2214 = vmatprep.mubr.msk.bf16.mxu0 %vm2524_vm0, %v2523_v27 }
  0x88   : > { %2234 = vmatprep.mubr.msk.bf16.mxu1 %vm2524_vm0, %v2523_v27  ;;  %2219 = vmatpush3.bf16.msra.mxu1 %v2406_v62 }
  0x89   : > { %2220 = vmatprep.subr.bf16.mxu1 %v2523_v27 }
  0x8a   : > { %2201 = vmatpush3.bf16.msra.mxu0 %v2399_v28 }
  0x8b   : > { %2202 = vmatprep.subr.bf16.mxu0 %v2523_v27 }
  0x8c   : > { %2221 = vmatpush3.bf16.msra.mxu1 %v2407_v63 }
  0x8d   : > { %2222 = vmatprep.subr.bf16.mxu1 %v2523_v27 }
  0x8e   : > { %2203 = vmatpush3.bf16.msra.mxu0 %v2400_v29 }
  0x8f   : > { %2204 = vmatprep.subr.bf16.mxu0 %v2523_v27 }
  0x90   : > { %2223 = vmatpush3.bf16.msra.mxu1 %v2408_v0 }
  0x91   : > { %2224 = vmatprep.subr.bf16.mxu1 %v2523_v27 }
  0x92   : > { %2205 = vmatpush3.bf16.msra.mxu0 %v2401_v31  ;;  %v2778_v31 = vsub.s32 0, %v2681_v30 }
  0x93   : > { %2206 = vmatprep.subr.bf16.mxu0 %v2523_v27 }
  0x94   : > { %2225 = vmatpush3.bf16.msra.mxu1 %v2409_v1 }
  0x95   : > { %2226 = vmatprep.subr.bf16.mxu1 %v2523_v27 }
  0x96   : > { %2207 = vmatpush3.bf16.msra.mxu0 %v2402_v32  ;;  %v1328_v32 = vld [vmem:[%s2897_s4] sm:$0x3] }
  0x97   : > { %2208 = vmatprep.subr.bf16.mxu0 %v2523_v27 }
  0x98   : > { %2227 = vmatpush3.bf16.msra.mxu1 %v2410_v2 }
  0x99   : > { %2228 = vmatprep.subr.bf16.mxu1 %v2523_v27 }
  0x9a   : > { %2209 = vmatpush3.bf16.msra.mxu0 %v2403_v33  ;;  %v2784_v33 = vsub.s32 1, %v2681_v30  ;;  %v2415_v30 = vld [vmem:[%s2900_s7 + $0x8] sm:$0xff]  }
  0x9b   : > { %2210 = vmatprep.subr.bf16.mxu0 %v2523_v27 }
  0x9c   : > { %2229 = vmatpush3.bf16.msra.mxu1 %v2411_v3 }
  0x9d   : > { %2230 = vmatprep.subr.bf16.mxu1 %v2523_v27 }
  0x9e   : > { %2211 = vmatpush3.bf16.msra.mxu0 %v2404_v34  ;;  %v1335_v34 = vrot.slane %v1328_v32, %v2778_v31 }
  0x9f   : > { %2212 = vmatprep.subr.bf16.mxu0 %v2523_v27 }
  0xa0   : > { %2231 = vmatpush3.bf16.msra.mxu1 %v2412_v4 }
  0xa1   : > { %2232 = vmatprep.subr.bf16.mxu1 %v2523_v27 }
  0xa2   : > { %2213 = vmatpush3.bf16.msra.mxu0 %v2405_v35 }
  0xa3   : > { %2238 = vmatprep.subr.bf16.mxu0 %v2523_v27 }
  0xa4   : > { %2233 = vmatpush3.bf16.msra.mxu1 %v2413_v5 }
  0xa5   : > { %2258 = vmatprep.subr.bf16.mxu1 %v2523_v27 }
 0x138   : > { %v2081_v36 = vpop.f32.mrb[0].mxu0 }
 0x139   : > { %v2082_v38 = vpop.f32.mrb[1].mxu0  ;;  %v2103_v39 = vpop.f32.mrb[0].mxu1 }
 0x13a   : > { %v2083_v40 = vadd.f32 %v2082_v38, %v2081_v36  ;;  %v2084_v41 = vpop.f32.mrb[2].mxu0  ;;  %v2104_v42 = vpop.f32.mrb[1].mxu1 }
 0x13b   : > { %v2085_v43 = vpop.f32.mrb[3].mxu0  ;;  %v2105_v45 = vadd.f32 %v2104_v42, %v2103_v39  ;;  %v2106_v46 = vpop.f32.mrb[2].mxu1  ;;  %v2414_v42 = vld [vmem:[%s2900_s7] sm:$0xff]  }
 0x13c   : > { %v1078_v44 = vadd.f32 %v2083_v40, %v1956_v37  ;;  %v2107_v47 = vpop.f32.mrb[3].mxu1  ;;  %v1340_v37 = vrot.slane %v1328_v32, %v2784_v33  ;;  %v2416_v43 = vld [vmem:[%s2900_s7 + $0x10] sm:$0xff]   ;;  %v2419_v46 = vld [vmem:[%s2900_s7 + $0x28] sm:$0xff]  }
 0x13d   : > { %v2420_v47 = vld [vmem:[%s2900_s7 + $0x30] sm:$0xff]  }
 0x13e   : > { %v1118_v48 = vadd.f32 %v2105_v45, %v1078_v44  ;;  %v2417_v44 = vld [vmem:[%s2900_s7 + $0x18] sm:$0xff]   ;;  %v2418_v45 = vld [vmem:[%s2900_s7 + $0x20] sm:$0xff]  }
 0x158   : > { %v2125_v49 = vpop.f32.mrb[4].mxu0 }
 0x159   : > { %v2126_v50 = vpop.f32.mrb[5].mxu0  ;;  %v2147_v51 = vpop.f32.mrb[4].mxu1 }
 0x15a   : > { %v2127_v52 = vadd.f32 %v2126_v50, %v2125_v49  ;;  %v2128_v53 = vpop.f32.mrb[6].mxu0  ;;  %v2148_v54 = vpop.f32.mrb[5].mxu1 }
 0x15b   : > { %v2129_v55 = vpop.f32.mrb[7].mxu0  ;;  %v2149_v57 = vadd.f32 %v2148_v54, %v2147_v51  ;;  %v2150_v58 = vpop.f32.mrb[6].mxu1 }
 0x15c   : > { %v1158_v56 = vadd.f32 %v2127_v52, %v1118_v48  ;;  %v2151_v59 = vpop.f32.mrb[7].mxu1  ;;  %v2421_v48 = vld [vmem:[%s2900_s7 + $0x38] sm:$0xff]  }
 0x15e   : > { %v1198_v60 = vadd.f32 %v2149_v57, %v1158_v56 }
 0x160   : > { %v1203_v61 = vpack.c.bf16 %v1198_v60, %v1198_v60 }
 0x162   : > { %2215 = vmatmul.mubr.bf16.vlgmr.msra.gmra.mrb[8].mxu0 %v1203_v61 }
 0x163   : > { %2254 = vmatprep.mubr.msk.bf16.mxu0 %vm2524_vm0, %v2523_v27  ;;  %2239 = vmatpush3.bf16.msra.mxu0 %v2414_v42 }
 0x164   : > { %2240 = vmatprep.subr.bf16.mxu0 %v2523_v27 }
 0x167   : > { %2241 = vmatpush3.bf16.msra.mxu0 %v2415_v30 }
 0x168   : > { %2242 = vmatprep.subr.bf16.mxu0 %v2523_v27 }
 0x16b   : > { %2243 = vmatpush3.bf16.msra.mxu0 %v2416_v43 }
 0x16c   : > { %2244 = vmatprep.subr.bf16.mxu0 %v2523_v27 }
 0x16f   : > { %2245 = vmatpush3.bf16.msra.mxu0 %v2417_v44 }
 0x170   : > { %2246 = vmatprep.subr.bf16.mxu0 %v2523_v27 }
 0x173   : > { %2247 = vmatpush3.bf16.msra.mxu0 %v2418_v45 }
 0x174   : > { %2248 = vmatprep.subr.bf16.mxu0 %v2523_v27 }
 0x177   : > { %2249 = vmatpush3.bf16.msra.mxu0 %v2419_v46 }
 0x178   : > { %2250 = vmatprep.subr.bf16.mxu0 %v2523_v27 }
 0x17b   : > { %2251 = vmatpush3.bf16.msra.mxu0 %v2420_v47 }
 0x17c   : > { %2252 = vmatprep.subr.bf16.mxu0 %v2523_v27 }
 0x17f   : > { %2253 = vmatpush3.bf16.msra.mxu0 %v2421_v48 }
 0x180   : > { %2278 = vmatprep.subr.bf16.mxu0 %v2523_v27 }
 0x235   : > { %v1302_v6 = vpop.f32.mrb[8].mxu0 }
 0x236   : > { %v1309_v7 = vsel %vm1308_vm1, %v1302_v6, 0.0  ;;  %v2216_v8 = vpop.f32.mrb[9].mxu0 }
 0x237   : > { %v1310_v9 = vrot.slane %v1309_v7, 4  ;;  %v1305_v10 = vpop.f32.mrb[10].mxu0  ;;  %v1466_v8 = vld [vmem:[%s2899_s6] sm:$0x3] }
 0x238   : > { %v2217_v11 = vpop.f32.mrb[11].mxu0 }
 0x239   : > { %v1311_v12 = vadd.f32 %v1310_v9, %v1309_v7  ;;  %v1473_v9 = vrot.slane %v1466_v8, %v2778_v31 }
 0x23b   : > { %v1312_v13 = vrot.slane %v1311_v12, 2 }
 0x23d   : > { %v1313_v14 = vadd.f32 %v1312_v13, %v1311_v12  ;;  %v1478_v12 = vrot.slane %v1466_v8, %v2784_v33 }
 0x23f   : > { %v1314_v15 = vrot.slane %v1313_v14, 1 }
 0x241   : > { %v1315_v16 = vadd.f32 %v1314_v15, %v1313_v14 }
 0x243   : > { %v1317_v17 = vmul.f32 0.5, %v1315_v16 }
 0x245   : > { %v1318_v18 = vsub.f32 %v1302_v6, %v1317_v17  ;;  %v2422_v17 = vld [vmem:[%s2902_s9] sm:$0xff]  }
 0x247   : > { %v1319_v19 = vmul.f32 %v1318_v18, %v1318_v18 }
 0x249   : > { %v1320_v20 = vsel %vm1308_vm1, %v1319_v19, 0.0  ;;  %v2424_v19 = vld [vmem:[%s2902_s9 + $0x10] sm:$0xff]  }
 0x24a   : > { %v1321_v21 = vrot.slane %v1320_v20, 4 }
 0x24c   : > { %v1322_v22 = vadd.f32 %v1321_v21, %v1320_v20  ;;  %v2425_v20 = vld [vmem:[%s2902_s9 + $0x18] sm:$0xff]   ;;  %v2426_v21 = vld [vmem:[%s2902_s9 + $0x20] sm:$0xff]  }
 0x24e   : > { %v1323_v23 = vrot.slane %v1322_v22, 2 }
 0x250   : > { %v1324_v24 = vadd.f32 %v1323_v23, %v1322_v22  ;;  %v2427_v22 = vld [vmem:[%s2902_s9 + $0x28] sm:$0xff]   ;;  %v2428_v23 = vld [vmem:[%s2902_s9 + $0x30] sm:$0xff]  }
 0x252   : > { %v1325_v25 = vrot.slane %v1324_v24, 1 }
 0x254   : > { %v1326_v26 = vadd.f32 %v1325_v25, %v1324_v24  ;;  %v2429_v24 = vld [vmem:[%s2902_s9 + $0x38] sm:$0xff]  }
 0x256   : > { %v1327_v28 = vmul.f32 0.5, %v1326_v26 }
 0x258   : > { %v1329_v29 = vadd.f32 1e-05, %v1327_v28 }
 0x25a   : > { %2438 = vrsqrt.f32 %v1329_v29 }
 0x264   : > { %v2439_v35 = vpop.eup %2438 }
 0x265   : > { %v1331_v36 = vmul.f32 %v2439_v35, %v1318_v18  ;;  %v2423_v18 = vld [vmem:[%s2902_s9 + $0x8] sm:$0xff]  }
 0x267   : > { %v1336_v38 = vmul.f32 %v1335_v34, %v1331_v36 }
 0x269   : > { %v1341_v39 = vadd.f32 %v1340_v37, %v1336_v38 }
 0x26b   : > { %v1342_v40 = vmax.f32 %v1341_v39, 0.0 }
 0x26d   : > { %v1343_v41 = vpack.c.bf16 %v1342_v40, %v1342_v40 }
 0x26f   : > { %2235 = vmatmul.mubr.bf16.vlgmr.msra.gmra.mrb[8].mxu1 %v1343_v41 }
 0x270   : > { %2274 = vmatprep.mubr.msk.bf16.mxu1 %vm2524_vm0, %v2523_v27  ;;  %2259 = vmatpush3.bf16.msra.mxu1 %v2422_v17 }
 0x271   : > { %2260 = vmatprep.subr.bf16.mxu1 %v2523_v27 }
 0x274   : > { %2261 = vmatpush3.bf16.msra.mxu1 %v2423_v18 }
 0x275   : > { %2262 = vmatprep.subr.bf16.mxu1 %v2523_v27 }
 0x278   : > { %2263 = vmatpush3.bf16.msra.mxu1 %v2424_v19 }
 0x279   : > { %2264 = vmatprep.subr.bf16.mxu1 %v2523_v27 }
 0x27c   : > { %2265 = vmatpush3.bf16.msra.mxu1 %v2425_v20 }
 0x27d   : > { %2266 = vmatprep.subr.bf16.mxu1 %v2523_v27 }
 0x280   : > { %2267 = vmatpush3.bf16.msra.mxu1 %v2426_v21 }
 0x281   : > { %2268 = vmatprep.subr.bf16.mxu1 %v2523_v27 }
 0x284   : > { %2269 = vmatpush3.bf16.msra.mxu1 %v2427_v22 }
 0x285   : > { %2270 = vmatprep.subr.bf16.mxu1 %v2523_v27 }
 0x288   : > { %2271 = vmatpush3.bf16.msra.mxu1 %v2428_v23 }
 0x289   : > { %2272 = vmatprep.subr.bf16.mxu1 %v2523_v27 }
 0x28c   : > { %2273 = vmatpush3.bf16.msra.mxu1 %v2429_v24 }
 0x342   : > { %v1442_v49 = vpop.f32.mrb[8].mxu1 }
 0x343   : > { %v1448_v50 = vsel %vm1308_vm1, %v1442_v49, 0.0  ;;  %v2236_v51 = vpop.f32.mrb[9].mxu1 }
 0x344   : > { %v1449_v52 = vrot.slane %v1448_v50, 4  ;;  %v1445_v53 = vpop.f32.mrb[10].mxu1  ;;  %v1604_v51 = vld [vmem:[%s2901_s8] sm:$0x3] }
 0x345   : > { %v2237_v54 = vpop.f32.mrb[11].mxu1 }
 0x346   : > { %v1450_v55 = vadd.f32 %v1449_v52, %v1448_v50  ;;  %v1611_v52 = vrot.slane %v1604_v51, %v2778_v31 }
 0x348   : > { %v1451_v56 = vrot.slane %v1450_v55, 2 }
 0x34a   : > { %v1452_v57 = vadd.f32 %v1451_v56, %v1450_v55  ;;  %v1616_v55 = vrot.slane %v1604_v51, %v2784_v33 }
 0x34c   : > { %v1453_v58 = vrot.slane %v1452_v57, 1 }
 0x34e   : > { %v1454_v59 = vadd.f32 %v1453_v58, %v1452_v57 }
 0x350   : > { %v1455_v60 = vmul.f32 0.5, %v1454_v59  ;;  %v2430_v59 = vld [vmem:[#allocation4] sm:$0xff]  }
 0x352   : > { %v1456_v61 = vsub.f32 %v1442_v49, %v1455_v60  ;;  %v2431_v60 = vld [vmem:[#allocation4 + $0x8] sm:$0xff]  }
 0x354   : > { %v1457_v62 = vmul.f32 %v1456_v61, %v1456_v61 }
 0x356   : > { %v1458_v63 = vsel %vm1308_vm1, %v1457_v62, 0.0  ;;  %v2433_v62 = vld [vmem:[#allocation4 + $0x18] sm:$0xff]  }
 0x357   : > { %v1459_v0 = vrot.slane %v1458_v63, 4 }
 0x359   : > { %v1460_v1 = vadd.f32 %v1459_v0, %v1458_v63  ;;  %v2434_v63 = vld [vmem:[#allocation4 + $0x20] sm:$0xff]   ;;  %v2435_v0 = vld [vmem:[#allocation4 + $0x28] sm:$0xff]  }
 0x35b   : > { %v1461_v2 = vrot.slane %v1460_v1, 2 }
 0x35d   : > { %v1462_v3 = vadd.f32 %v1461_v2, %v1460_v1  ;;  %v2436_v1 = vld [vmem:[#allocation4 + $0x30] sm:$0xff]   ;;  %v2437_v2 = vld [vmem:[#allocation4 + $0x38] sm:$0xff]  }
 0x35f   : > { %v1463_v4 = vrot.slane %v1462_v3, 1 }
 0x361   : > { %v1464_v5 = vadd.f32 %v1463_v4, %v1462_v3 }
 0x363   : > { %v1465_v6 = vmul.f32 0.5, %v1464_v5 }
 0x365   : > { %v1467_v7 = vadd.f32 1e-05, %v1465_v6 }
 0x367   : > { %2440 = vrsqrt.f32 %v1467_v7 }
 0x371   : > { %v2441_v10 = vpop.eup %2440 }
 0x372   : > { %v1469_v11 = vmul.f32 %v2441_v10, %v1456_v61  ;;  %v2432_v61 = vld [vmem:[#allocation4 + $0x10] sm:$0xff]  }
 0x374   : > { %v1474_v13 = vmul.f32 %v1473_v9, %v1469_v11 }
 0x376   : > { %v1479_v14 = vadd.f32 %v1478_v12, %v1474_v13 }
 0x378   : > { %v1480_v15 = vmax.f32 %v1479_v14, 0.0 }
 0x37a   : > { %v1481_v16 = vpack.c.bf16 %v1480_v15, %v1480_v15 }
 0x37c   : > { %2255 = vmatmul.mubr.bf16.vlgmr.msra.gmra.mrb[12].mxu0 %v1481_v16 }
 0x37d   : > { %2294 = vmatprep.mubr.msk.bf16.mxu0 %vm2524_vm0, %v2523_v27  ;;  %2279 = vmatpush3.bf16.msra.mxu0 %v2430_v59 }
 0x37e   : > { %2280 = vmatprep.subr.bf16.mxu0 %v2523_v27 }
 0x381   : > { %2281 = vmatpush3.bf16.msra.mxu0 %v2431_v60 }
 0x382   : > { %2282 = vmatprep.subr.bf16.mxu0 %v2523_v27 }
 0x385   : > { %2283 = vmatpush3.bf16.msra.mxu0 %v2432_v61 }
 0x386   : > { %2284 = vmatprep.subr.bf16.mxu0 %v2523_v27 }
 0x389   : > { %2285 = vmatpush3.bf16.msra.mxu0 %v2433_v62 }
 0x38a   : > { %2286 = vmatprep.subr.bf16.mxu0 %v2523_v27 }
 0x38d   : > { %2287 = vmatpush3.bf16.msra.mxu0 %v2434_v63 }
 0x38e   : > { %2288 = vmatprep.subr.bf16.mxu0 %v2523_v27 }
 0x391   : > { %2289 = vmatpush3.bf16.msra.mxu0 %v2435_v0 }
 0x392   : > { %2290 = vmatprep.subr.bf16.mxu0 %v2523_v27 }
 0x395   : > { %2291 = vmatpush3.bf16.msra.mxu0 %v2436_v1 }
 0x396   : > { %2292 = vmatprep.subr.bf16.mxu0 %v2523_v27 }
 0x399   : > { %2293 = vmatpush3.bf16.msra.mxu0 %v2437_v2 }
 0x44f   : > { %v1580_v25 = vpop.f32.mrb[12].mxu0 }
 0x450   : > { %v1586_v26 = vsel %vm1308_vm1, %v1580_v25, 0.0  ;;  %v2256_v28 = vpop.f32.mrb[13].mxu0 }
 0x451   : > { %v1587_v29 = vrot.slane %v1586_v26, 4  ;;  %v1583_v32 = vpop.f32.mrb[14].mxu0 }
 0x452   : > { %v2257_v34 = vpop.f32.mrb[15].mxu0 }
 0x453   : > { %v1588_v35 = vadd.f32 %v1587_v29, %v1586_v26 }
 0x455   : > { %v1589_v36 = vrot.slane %v1588_v35, 2 }
 0x457   : > { %v1590_v37 = vadd.f32 %v1589_v36, %v1588_v35 }
 0x459   : > { %v1591_v38 = vrot.slane %v1590_v37, 1 }
 0x45b   : > { %v1592_v39 = vadd.f32 %v1591_v38, %v1590_v37  ;;  %v2053_v38 = vld [vmem:[%s2905_s12] ss:$0 sm:$0xff] }
 0x45d   : > { %v1593_v40 = vmul.f32 0.5, %v1592_v39 }
 0x45f   : > { %v1594_v41 = vsub.f32 %v1580_v25, %v1593_v40  ;;  %v1741_v25 = vld [vmem:[%s2903_s10] sm:$0x3] }
 0x460   : > { %v1748_v26 = vrot.slane %v1741_v25, %v2778_v31  ;;  %v1753_v32 = vrot.slane %v1741_v25, %v2784_v33 }
 0x461   : > { %v1595_v42 = vmul.f32 %v1594_v41, %v1594_v41 }
 0x463   : > { %v1596_v30 = vsel %vm1308_vm1, %v1595_v42, 0.0 }
 0x464   : > { %v1597_v43 = vrot.slane %v1596_v30, 4 }
 0x466   : > { %v1598_v44 = vadd.f32 %v1597_v43, %v1596_v30 }
 0x468   : > { %v1599_v45 = vrot.slane %v1598_v44, 2 }
 0x46a   : > { %v1600_v46 = vadd.f32 %v1599_v45, %v1598_v44 }
 0x46c   : > { %v1601_v47 = vrot.slane %v1600_v46, 1 }
 0x46e   : > { %v1602_v48 = vadd.f32 %v1601_v47, %v1600_v46 }
 0x470   : > { %v1603_v49 = vmul.f32 0.5, %v1602_v48 }
 0x472   : > { %v1605_v50 = vadd.f32 1e-05, %v1603_v49 }
 0x474   : > { %2442 = vrsqrt.f32 %v1605_v50 }
 0x47e   : > { %v2443_v53 = vpop.eup %2442 }
 0x47f   : > { %v1607_v54 = vmul.f32 %v2443_v53, %v1594_v41 }
 0x481   : > { %v1612_v56 = vmul.f32 %v1611_v52, %v1607_v54 }
 0x483   : > { %v1617_v57 = vadd.f32 %v1616_v55, %v1612_v56 }
 0x485   : > { %v1618_v58 = vpack.c.bf16 %v1617_v57, %v1617_v57 }
 0x487   : > { %2275 = vmatmul.mubr.bf16.vlgmr.msra.gmra.mrb[12].mxu1 %v1618_v58 }
 0x55a   : > { %v1717_v3 = vpop.f32.mrb[12].mxu1 }
 0x55b   : > { %v1723_v4 = vsel %vm1308_vm1, %v1717_v3, 0.0  ;;  %v2276_v5 = vpop.f32.mrb[13].mxu1 }
 0x55c   : > { %v1724_v6 = vrot.slane %v1723_v4, 4  ;;  %v1720_v7 = vpop.f32.mrb[14].mxu1 }
 0x55d   : > { %v2277_v8 = vpop.f32.mrb[15].mxu1 }
 0x55e   : > { %v1725_v9 = vadd.f32 %v1724_v6, %v1723_v4 }
 0x560   : > { %v1726_v10 = vrot.slane %v1725_v9, 2 }
 0x562   : > { %v1727_v11 = vadd.f32 %v1726_v10, %v1725_v9 }
 0x564   : > { %v1728_v12 = vrot.slane %v1727_v11, 1 }
 0x566   : > { %v1729_v13 = vadd.f32 %v1728_v12, %v1727_v11 }
 0x568   : > { %v1730_v14 = vmul.f32 0.5, %v1729_v13 }
 0x56a   : > { %v1731_v15 = vsub.f32 %v1717_v3, %v1730_v14 }
 0x56c   : > { %v1732_v16 = vmul.f32 %v1731_v15, %v1731_v15 }
 0x56e   : > { %v1733_v17 = vsel %vm1308_vm1, %v1732_v16, 0.0 }
 0x56f   : > { %v1734_v18 = vrot.slane %v1733_v17, 4 }
 0x571   : > { %v1735_v27 = vadd.f32 %v1734_v18, %v1733_v17 }
 0x573   : > { %v1736_v19 = vrot.slane %v1735_v27, 2 }
 0x575   : > { %v1737_v20 = vadd.f32 %v1736_v19, %v1735_v27 }
 0x577   : > { %v1738_v21 = vrot.slane %v1737_v20, 1 }
 0x579   : > { %v1739_v22 = vadd.f32 %v1738_v21, %v1737_v20 }
 0x57b   : > { %v1740_v23 = vmul.f32 0.5, %v1739_v22 }
 0x57d   : > { %v1742_v24 = vadd.f32 1e-05, %v1740_v23 }
 0x57f   : > { %2444 = vrsqrt.f32 %v1742_v24 }
 0x589   : > { %v2445_v28 = vpop.eup %2444 }
 0x58a   : > { %v1744_v29 = vmul.f32 %v2445_v28, %v1731_v15 }
 0x58c   : > { %v1749_v34 = vmul.f32 %v1748_v26, %v1744_v29 }
 0x58e   : > { %v1754_v35 = vadd.f32 %v1753_v32, %v1749_v34 }
 0x590   : > { %v1755_v36 = vmax.f32 %v1754_v35, 0.0 }
 0x592   : > { %v1756_v37 = vpack.c.bf16 %v1755_v36, %v1755_v36 }
 0x594   : > { %2295 = vmatmul.mubr.bf16.vlgmr.msra.gmra.mrb[16].mxu0 %v1756_v37 }
 0x667   : > { %v1862_v39 = vpop.f32.mrb[16].mxu0 }
 0x668   : > { %v1863_v31 = vadd.f32 %v2053_v38, %v1862_v39  ;;  %v2296_v40 = vpop.f32.mrb[17].mxu0 }
 0x669   : > { %v1865_v41 = vpop.f32.mrb[18].mxu0 }
 0x66a   : > { %1868 = vst [vmem:[%s468_s20] sm:$0x3] %v1863_v31  ;;  %v2297_v33 = vpop.f32.mrb[19].mxu0 }
 0x66b PF: > { %s25_s25 = sadd.s32 1, %s2516_s25  }
 0x66c   : > { %p22_p9 = scmp.ge.s32.totalorder %s25_s25, 4  }
 0x66e   :  { %24 = sbr.rel (!%p22_p9) target bundleno = 2 (0x2), region = 111 }
 0x675   :  { %1888 = vsyncpa [#allocation3], 1 }
 0x676   :  { %1890 = vsyncpa [#allocation3 + $0x1], 1 }
 0x677   :  { %1891 = vsyncpa [#allocation5], 1 }

</bundles_post_ra>
